<compile_context>
chip_gen: v5e
topology: v5e:2x2
jax: 0.10.0
libtpu: 0.0.40
codegen_flags: <defaults>
</compile_context>

<pallas_src>
import functools

import jax
import jax.numpy as jnp
from jax.experimental import pallas as pl
from jax.experimental.pallas import tpu as pltpu


_H = 20                              # hidden width of the PINN MLP
_NLAYERS = 4
_LSTRIDE = 24                        # rows reserved per layer (20 -> multiple of 8)
_BIAS_BASE = _NLAYERS * _LSTRIDE     # biases stored below the weights, column 0
_SLAB_LANES = 128                    # lane-pad the param slab -> full-lane DMA

# VMEM budgeting (generation-aware): 48 MiB scoped limit is below v7x's 64 MiB
# physical and above v5e's 16 MiB default; the tile cap keeps live f32
# intermediates (~a few (24, tile) slabs + double-buffered (1, tile) I/O, i.e.
# conservatively ~512 B per batch element) under ~50% of that limit.
_VMEM_LIMIT_BYTES = 48 * 1024 * 1024
_BYTES_PER_LANE = 512
_MAX_TILE = (_VMEM_LIMIT_BYTES // 2 // _BYTES_PER_LANE) // 128 * 128   # ~49k lanes


def pack_params(params):
    """Pack W^T and biases of all 4 layers into a single f32 slab.

    rows [24*l, 24*l + out_f), cols [0, in_f)            -> W_l^T   (out_f, in_f)
    rows [96 + 24*l, 96 + 24*l + out_f), col 0           -> b_l     (column vector)
    Row offsets are multiples of 8 (sublane tile) for cheap in-kernel slices;
    lane dim padded to 128 so the one-time slab DMA is full-lane.
    """
    w1, b1, w2, b2, w3, b3, w4, b4 = params
    slab = jnp.zeros((2 * _NLAYERS * _LSTRIDE, _SLAB_LANES), jnp.float32)
    for l, (w, b) in enumerate(((w1, b1), (w2, b2), (w3, b3), (w4, b4))):
        in_f, out_f = w.shape
        r = l * _LSTRIDE
        slab = slab.at[r:r + out_f, 0:in_f].set(w.T)
        slab = slab.at[_BIAS_BASE + r:_BIAS_BASE + r + out_f, 0].set(b)
    return slab


def _layer_wb(w_ref, l, out_f, in_f):
    r = l * _LSTRIDE
    wt = w_ref[r:r + out_f, 0:in_f]                            # (out_f, in_f)
    b = w_ref[_BIAS_BASE + r:_BIAS_BASE + r + out_f, 0:1]      # (out_f, 1)
    return wt, b


def _pinn_kernel(x_ref, t_ref, w_ref, o_ref, *, act_dtype):
    # x_ref / t_ref: (1, tile) tiles with the batch on lanes.
    x = x_ref[...]
    t = t_ref[...]

    def act(z):
        # tanh is the binding EUP op; optional bf16 halves the EUP pushes on
        # v6e/v7x (matmul accumulation stays f32 either way).
        if act_dtype == jnp.float32:
            return jnp.tanh(z)
        return jnp.tanh(z.astype(act_dtype)).astype(jnp.float32)

    # Layer 1 (in_features = 2): two rank-1 broadcast multiplies on the VPU
    # instead of a K=2 matmul; avoids materializing a (2, tile) concat.
    w1t, b1 = _layer_wb(w_ref, 0, _H, 2)
    h = act(w1t[:, 0:1] * x + w1t[:, 1:2] * t + b1)            # (H, tile)

    # Layers 2, 3: (H, H) @ (H, tile) on the MXU, f32 accumulation.
    w2t, b2 = _layer_wb(w_ref, 1, _H, _H)
    h = act(jnp.dot(w2t, h, preferred_element_type=jnp.float32) + b2)

    w3t, b3 = _layer_wb(w_ref, 2, _H, _H)
    h = act(jnp.dot(w3t, h, preferred_element_type=jnp.float32) + b3)

    # Output layer: (1, H) @ (H, tile) -> (1, tile): lane-dense stores.
    w4t, b4 = _layer_wb(w_ref, 3, 1, _H)
    out = jnp.dot(w4t, h, preferred_element_type=jnp.float32) + b4
    o_ref[...] = out.astype(o_ref.dtype)


def _round_up(a, m):
    return (a + m - 1) // m * m


def _cdiv(a, b):
    return (a + b - 1) // b


def _pick_tile(n, tm):
    """Static tile-size selection (pure Python arithmetic on shapes).

    - lane-aligned (multiple of 128), capped by the VMEM budget and the batch
    - prefers an even number (>= 2) of balanced grid steps so both v7x
      TensorCores get work under dimension_semantics=("parallel",)
    """
    n128 = _round_up(max(n, 1), 128)
    tile = max(128, min(_round_up(tm, 128), _MAX_TILE, n128))
    if n128 >= 256:
        steps = _cdiv(n128, tile)
        target = max(2, steps + (steps % 2))            # smallest even >= max(2, steps)
        even_tile = _round_up(_cdiv(n128, target), 128)
        if _cdiv(n128, even_tile) % 2 == 0:             # only adopt if actually even
            tile = min(tile, even_tile)
    return tile


@functools.partial(jax.jit, static_argnames=("tm", "bf16_tanh"))
def pinn_forward(x, t, slab, *, tm=32768, bf16_tanh=False):
    """x, t: [N, 1] float32; slab: output of pack_params. Returns [N, 1] float32."""
    n = x.shape[0]

    # Lane-dense layout: batch on lanes. [N,1] -> [1,N] is a pure reshape
    # (same element order), so no transpose/copy in the wrapper — and no
    # jnp.pad: the ragged last block is handled by Pallas masked reads/writes.
    x_row = x.reshape(1, n)
    t_row = t.reshape(1, n)

    tile = _pick_tile(n, tm)
    grid = (_cdiv(n, tile),)

    act_dtype = jnp.bfloat16 if bf16_tanh else jnp.float32
    kernel = functools.partial(_pinn_kernel, act_dtype=act_dtype)

    out_row = pl.pallas_call(
        kernel,
        out_shape=jax.ShapeDtypeStruct((1, n), jnp.float32),
        grid=grid,
        in_specs=[
            pl.BlockSpec((1, tile), lambda i: (0, i)),     # x tile (lane-dense)
            pl.BlockSpec((1, tile), lambda i: (0, i)),     # t tile (lane-dense)
            pl.BlockSpec(slab.shape, lambda i: (0, 0)),    # packed params, resident
        ],
        out_specs=pl.BlockSpec((1, tile), lambda i: (0, i)),
        compiler_params=pltpu.CompilerParams(
            dimension_semantics=("parallel",),
            vmem_limit_bytes=_VMEM_LIMIT_BYTES),
    )(x_row, t_row, slab)

    return out_row.reshape(n, 1)


def init_params(key):
    """Deterministic init matching nn.Linear default: U(-1/sqrt(fan_in), +1/sqrt(fan_in))."""
    dims = [(2, 20), (20, 20), (20, 20), (20, 1)]
    params = []
    for (fan_in, fan_out) in dims:
        key, kw, kb = jax.random.split(key, 3)
        bound = 1.0 / jnp.sqrt(fan_in)
        w = jax.random.uniform(kw, (fan_in, fan_out), jnp.float32, -bound, bound)
        b = jax.random.uniform(kb, (fan_out,), jnp.float32, -bound, bound)
        params += [w, b]
    return tuple(params)


def pinn_reference(x, t, params):
    """Pure-JAX reference for correctness checking."""
    w1, b1, w2, b2, w3, b3, w4, b4 = params
    h = jnp.concatenate([x, t], axis=1)
    h = jnp.tanh(h @ w1 + b1)
    h = jnp.tanh(h @ w2 + b2)
    h = jnp.tanh(h @ w3 + b3)
    return h @ w4 + b4


if __name__ == "__main__":
    key = jax.random.PRNGKey(0)
    kp, kx, kt = jax.random.split(key, 3)

    params = init_params(kp)
    slab = pack_params(params)

    # Small demo batch, deliberately NOT a multiple of 128 to exercise the
    # masked ragged-tail path (no wrapper-side padding any more).
    N = 300
    x = jax.random.uniform(kx, (N, 1), jnp.float32)
    t = jax.random.uniform(kt, (N, 1), jnp.float32)

    # Default tm=32768: tile picker clamps to the batch and splits it into an
    # even number of grid steps (here tile=256, 2 steps).
    out = pinn_forward(x, t, slab)
    out = jax.block_until_ready(out)

    ref = pinn_reference(x, t, params)
    assert out.shape == (N, 1), out.shape
    assert jnp.allclose(out, ref, atol=1e-5, rtol=1e-5), "mismatch vs reference"

    print("KERNEL_OK")
</pallas_src>

<mosaic_0001>
module attributes {stable_mosaic.version = 11 : i64} {
  func.func @_pinn_kernel(%arg0: i32, %arg1: memref<1x256xf32, #tpu.memory_space<vmem>>, %arg2: memref<1x256xf32, #tpu.memory_space<vmem>>, %arg3: memref<192x128xf32, #tpu.memory_space<vmem>>, %arg4: memref<1x256xf32, #tpu.memory_space<vmem>>) attributes {dimension_semantics = [#tpu.dimension_semantics<parallel>], iteration_bounds = array<i64: 2>, scalar_prefetch = 0 : i64, scratch_operands = 0 : i64, tpu.core_type = #tpu.core_type<tc>, window_params = [{transform_indices = @transform_0, window_bounds = array<i64: 1, 256>}, {transform_indices = @transform_1, window_bounds = array<i64: 1, 256>}, {pipeline_mode = #tpu.pipeline_mode<synchronous>, transform_indices = @transform_2, window_bounds = array<i64: 192, 128>}, {transform_indices = @transform_3, window_bounds = array<i64: 1, 256>}]} {
    %c0 = arith.constant 0 : index
    %c0_0 = arith.constant 0 : index
    %0 = vector.load %arg1[%c0, %c0_0] : memref<1x256xf32, #tpu.memory_space<vmem>>, vector<1x256xf32>
    %c0_1 = arith.constant 0 : index
    %c0_2 = arith.constant 0 : index
    %1 = vector.load %arg2[%c0_1, %c0_2] : memref<1x256xf32, #tpu.memory_space<vmem>>, vector<1x256xf32>
    %c0_3 = arith.constant 0 : index
    %c0_4 = arith.constant 0 : index
    %2 = vector.load %arg3[%c0_3, %c0_4] : memref<192x128xf32, #tpu.memory_space<vmem>>, vector<20x2xf32>
    %c96 = arith.constant 96 : index
    %c0_5 = arith.constant 0 : index
    %3 = vector.load %arg3[%c96, %c0_5] : memref<192x128xf32, #tpu.memory_space<vmem>>, vector<20x1xf32>
    %4 = vector.extract_strided_slice %2 {offsets = [0, 0], sizes = [20, 1], strides = [1, 1]} : vector<20x2xf32> to vector<20x1xf32>
    %5 = vector.broadcast %4 : vector<20x1xf32> to vector<20x256xf32>
    %6 = vector.broadcast %0 : vector<1x256xf32> to vector<20x256xf32>
    %7 = arith.mulf %5, %6 : vector<20x256xf32>
    %8 = vector.extract_strided_slice %2 {offsets = [0, 1], sizes = [20, 1], strides = [1, 1]} : vector<20x2xf32> to vector<20x1xf32>
    %9 = vector.broadcast %8 : vector<20x1xf32> to vector<20x256xf32>
    %10 = vector.broadcast %1 : vector<1x256xf32> to vector<20x256xf32>
    %11 = arith.mulf %9, %10 : vector<20x256xf32>
    %12 = arith.addf %7, %11 : vector<20x256xf32>
    %13 = vector.broadcast %3 : vector<20x1xf32> to vector<20x256xf32>
    %14 = arith.addf %12, %13 : vector<20x256xf32>
    %15 = math.tanh %14 : vector<20x256xf32>
    %c24 = arith.constant 24 : index
    %c0_6 = arith.constant 0 : index
    %16 = vector.load %arg3[%c24, %c0_6] : memref<192x128xf32, #tpu.memory_space<vmem>>, vector<20x20xf32>
    %c120 = arith.constant 120 : index
    %c0_7 = arith.constant 0 : index
    %17 = vector.load %arg3[%c120, %c0_7] : memref<192x128xf32, #tpu.memory_space<vmem>>, vector<20x1xf32>
    %cst = arith.constant dense<0.000000e+00> : vector<20x256xf32>
    %18 = tpu.matmul %16, %15, %cst {dimension_numbers = #tpu.dot_dimension_numbers<[1], [0], [0], [1], [0, 0, 1, 1], [], []>} : vector<20x20xf32>, vector<20x256xf32>, vector<20x256xf32> -> vector<20x256xf32>
    %19 = vector.broadcast %17 : vector<20x1xf32> to vector<20x256xf32>
    %20 = arith.addf %18, %19 : vector<20x256xf32>
    %21 = math.tanh %20 : vector<20x256xf32>
    %c48 = arith.constant 48 : index
    %c0_8 = arith.constant 0 : index
    %22 = vector.load %arg3[%c48, %c0_8] : memref<192x128xf32, #tpu.memory_space<vmem>>, vector<20x20xf32>
    %c144 = arith.constant 144 : index
    %c0_9 = arith.constant 0 : index
    %23 = vector.load %arg3[%c144, %c0_9] : memref<192x128xf32, #tpu.memory_space<vmem>>, vector<20x1xf32>
    %cst_10 = arith.constant dense<0.000000e+00> : vector<20x256xf32>
    %24 = tpu.matmul %22, %21, %cst_10 {dimension_numbers = #tpu.dot_dimension_numbers<[1], [0], [0], [1], [0, 0, 1, 1], [], []>} : vector<20x20xf32>, vector<20x256xf32>, vector<20x256xf32> -> vector<20x256xf32>
    %25 = vector.broadcast %23 : vector<20x1xf32> to vector<20x256xf32>
    %26 = arith.addf %24, %25 : vector<20x256xf32>
    %27 = math.tanh %26 : vector<20x256xf32>
    %c72 = arith.constant 72 : index
    %c0_11 = arith.constant 0 : index
    %28 = vector.load %arg3[%c72, %c0_11] : memref<192x128xf32, #tpu.memory_space<vmem>>, vector<1x20xf32>
    %c168 = arith.constant 168 : index
    %c0_12 = arith.constant 0 : index
    %29 = vector.load %arg3[%c168, %c0_12] : memref<192x128xf32, #tpu.memory_space<vmem>>, vector<1x1xf32>
    %cst_13 = arith.constant dense<0.000000e+00> : vector<1x256xf32>
    %30 = tpu.matmul %28, %27, %cst_13 {dimension_numbers = #tpu.dot_dimension_numbers<[1], [0], [0], [1], [0, 0, 1, 1], [], []>} : vector<1x20xf32>, vector<20x256xf32>, vector<1x256xf32> -> vector<1x256xf32>
    %31 = vector.broadcast %29 : vector<1x1xf32> to vector<1x256xf32>
    %32 = arith.addf %30, %31 : vector<1x256xf32>
    %c0_14 = arith.constant 0 : index
    %c0_15 = arith.constant 0 : index
    %33 = vector.load %arg4[%c0_14, %c0_15] : memref<1x256xf32, #tpu.memory_space<vmem>>, vector<1x256xf32>
    tpu.vector_store %arg4[%c0_14, %c0_15], %32 {strides = array<i32>} : memref<1x256xf32, #tpu.memory_space<vmem>>, vector<1x256xf32>,
    return
  }
  func.func @transform_0(%arg0: i32) -> (i32, i32) {
    %c0_i32 = arith.constant 0 : i32
    %c0_i32_0 = arith.constant 0 : i32
    return %c0_i32, %arg0 : i32, i32
  }
  func.func @transform_1(%arg0: i32) -> (i32, i32) {
    %c0_i32 = arith.constant 0 : i32
    %c0_i32_0 = arith.constant 0 : i32
    return %c0_i32, %arg0 : i32, i32
  }
  func.func @transform_2(%arg0: i32) -> (i32, i32) {
    %c0_i32 = arith.constant 0 : i32
    %c0_i32_0 = arith.constant 0 : i32
    %c0_i32_1 = arith.constant 0 : i32
    return %c0_i32, %c0_i32_0 : i32, i32
  }
  func.func @transform_3(%arg0: i32) -> (i32, i32) {
    %c0_i32 = arith.constant 0 : i32
    %c0_i32_0 = arith.constant 0 : i32
    return %c0_i32, %arg0 : i32, i32
  }
}

</mosaic_0001>

<bundles_post_ra>
// kernel: pinn_forward.1
= control target key start
LH: loop header
LB: loop body
LE: loop exit
PB: predicated region body
PF: predicated region fallthrough
CT: control target
= control target key end

     0   :  { %s1356_s0 = inlined_call_operand.hbm [shape: f32[1,300], index: 0, kind: input, shape index: {}]   ;;  %s1357_s1 = inlined_call_operand.hbm [shape: f32[1,300], index: 1, kind: input, shape index: {}]   ;;  %s1358_s2 = inlined_call_operand.hbm [shape: f32[192,128], index: 2, kind: input, shape index: {}]   ;;  %s1359_s3 = inlined_call_operand.hbm [shape: f32[1,300], index: 3, kind: output, shape index: {}]  }
   0x1   :  { %1363 = sst [smem:[#allocation13_spill]] %s1358_s2 }
   0x2   :  { %8 = vsyncpa [#allocation3], 0 }
   0x3   :  { %10 = vsyncpa [#allocation3 + $0x1], 0 }
   0x4   :  { %11 = vsyncpa [#allocation6], 0 }
   0x5   :  { %13 = vsyncpa [#allocation6 + $0x1], 0 }
   0x6   :  { %14 = vsyncpa [#allocation4], 0 }
   0x7   :  { %16 = vsyncpa [#allocation4 + $0x1], 0  ;;  %s1097_s12 = smov 0   ;;  %s1099_s13 = smov 0  }
   0x8   :  { %s1101_s14 = smov 0   ;;  %s1103_s15 = smov 0  }
   0x9 LB: > { %s1118_s16 = sadd.s32 4294967295, %s1067_s15   ;;  %s735_s17 = sadd.s32 4294967294, %s1067_s15   ;;  %s1067_s15 = sphi %s1103_s15, %s1379_s15   ;;  %s1063_s14 = sphi %s1101_s14, %s1378_s14   ;;  %s1059_s13 = sphi %s1099_s13, %s1377_s13   ;;  %s1055_s12 = sphi %s1097_s12, %s1376_s12  }
   0xa   : > { %s1122_s18 = sadd.s32 1, %s1067_s15   ;;  %s29_s19 = sadd.s32 1, %s1063_s14 }
   0xb   : > { %s26_s20 = ssub.s32 %s1067_s15, %s1122_s18  ;;  %p36_p0 = scmp.ne.s32.totalorder %s1063_s14, %s1059_s13 }
   0xc   : > { %p27_p1 = scmp.eq.s32.totalorder %s26_s20, 0  ;;  %p37_p2 = scmp.eq.s32.totalorder %s1067_s15, 0 }
   0xd   : > { %p42_p3 = scmp.ne.s32.totalorder %s1059_s13, %s1055_s12  ;;  %p1361_p4 = scmp.eq.s32.totalorder %s1118_s16, 0 }
   0xe   : > { %s1134_s21 = scalar_select %p27_p1, %s1063_s14, %s29_s19  }
   0xf   : > { %p1136_p5 = por %p37_p2, %p36_p0  ;;  %p1142_p6 = por %p1361_p4, %p42_p3 }
  0x10   : > { %p113_p7 = scmp.eq.s32.totalorder %s1118_s16, 1  ;;  %p119_p8 = scmp.eq.s32.totalorder %s735_s17, 1 }
  0x11   : > { %p736_p9 = scmp.ge.s32.totalorder %s1067_s15, 1  ;;  %p126_p10 = scmp.lt.s32.totalorder %s1067_s15, 3 }
  0x12   : > { %p1149_p11 = por %p113_p7, %p36_p0  ;;  %p1153_p12 = por %p119_p8, %p42_p3 }
  0x13   : > { %p1157_p13 = pnand %p736_p9, %p126_p10  ;;  %s1369_s2 = sld [smem:[#allocation13_spill]] }
  0x14   : > { %s1366_s24 = scalar_select %p1149_p11, 1, 0 }
  0x15   : > { %s1367_s25 = scalar_select %p1153_p12, 1, 0 }
  0x16   : > { %p782_p1 = pneg %p1157_p13  ;;  %s1069_s30 = smov [#allocation7]  }
  0x17   : > { %s139_s4 = sshll.u32 %s1069_s30, 4  ;;  %s1070_s5 = smov 128   ;;  %s140_s4 = int_to_ptr.vmem [resolvable:$true] %s139_s4 }
  0x18   : > { %p783_p0 = pnand %p782_p1, %p1361_p4  ;;  %s1071_s6 = smov 8  }
  0x19   : > { %s137_s29 = sshll.u32 %s1369_s2, 4  ;;  %p1360_p2 = scmp.ge.s32.totalorder %s1067_s15, 2  ;;  %s138_s29 = int_to_ptr.hbm [resolvable:$true] %s137_s29 }
  0x1a   : > { %785 = dma.hbm_to_vmem [thread:$0]  (!%p783_p0), %s138_s29, 3072, %s140_s4, [#allocation6], %s1070_s5, %s1070_s5, %s1071_s6  }
  0x1b   : > { %149 = sbr.rel (%p1360_p2) target bundleno = 101 (0x65), region = 20 }
  0x20   : > { %152 = sbr.rel (!%p1136_p5) target bundleno = 67 (0x43), region = 24  ;;  %s153_s7 = sand.u32 (%p1136_p5), 1, %s1063_s14  }
  0x21   : > { %s740_s8 = sshll.u32 (%p1136_p5), %s1067_s15, 1  ;;  %s739_s9 = sshll.u32 (%p1136_p5), %s153_s7, 1 }
  0x22   : > { %s159_s10 = ssub.s32 (%p1136_p5), 3, %s740_s8  ;;  %s1178_s19 = scalar_lea.sflag (%p1136_p5), [#allocation3], %s153_s7 }
  0x23   : > { %p160_p3 = scmp.lt.s32.totalorder (%p1136_p5), %s159_s10, 2  ;;  %s157_s20 = scalar_lea.vmem (%p1136_p5), [#allocation2], %s739_s9 }
  0x25   : > { %s1381_s10 = smov (!%p160_p3, %s159_s10), 2 }
  0x26   : > { %s162_s11 = ssub.s32 2, %s1381_s10 }
  0x27   : > { %s163_s17 = sshll.u32 %s162_s11, 4 }
  0x28   : > { %164 = vsyncadd %s1178_s19, %s163_s17  ;;  %p741_p7 = scmp.ne.s32.totalorder %s1381_s10, 0  ;;  %s166_s29 = scalar_lea.hbm %s1356_s0, %s740_s8 }
  0x29   : > { %s1362_s30 = sshll.u32 %s1381_s10, 4  ;;  %s168_s4 = sshll.u32 %s166_s29, 4  ;;  %s1186_s4 = int_to_ptr.hbm [resolvable:$true] %s168_s4 }
  0x2a   : > { %s1188_s5 = sshll.u32 %s157_s20, 4  ;;  %s904_s6 = sshra.s32 %s1186_s4, 4  ;;  %s171_s5 = int_to_ptr.vmem [resolvable:$true] %s1188_s5  ;;  %s905_s6 = int_to_ptr.hbm [resolvable:$true] %s904_s6 }
  0x2b   : > { %s906_s7 = sshrl.u32 %s1362_s30, 4  ;;  %s915_s17 = scalar_lea.hbm %s1356_s0, 3 }
  0x2c   : > { %s911_s9 = scalar_lea.hbm %s905_s6, %s906_s7  ;;  %p916_p1 = scmp.lt.s32.totalorder %s905_s6, %s1356_s0 }
  0x2d   : > { %p912_p8 = scmp.ne.s32.totalorder %s905_s6, %s911_s9  ;;  %p917_p0 = scmp.lt.s32.totalorder %s915_s17, %s911_s9 }
  0x2f   : > { %p913_p9 = pnand %p912_p8, %p741_p7  ;;  %p918_p3 = por %p917_p0, %p916_p1 }
  0x31   : > { %p914_p10 = pneg %p913_p9 }
  0x33   : > { %p919_p2 = pnand %p918_p3, %p914_p10 }
  0x35   : > { %922 = shalt.err (!%p919_p2)
}
  0x36   : > { %s923_s20 = sshra.s32 %s171_s5, 4  ;;  %s1072_s30 = smov [#allocation2]   ;;  %s924_s20 = int_to_ptr.vmem [resolvable:$true] %s923_s20 }
  0x37   : > { %s930_s29 = scalar_lea.vmem %s924_s20, %s906_s7  ;;  %s934_s2 = scalar_lea.vmem %s1072_s30, 4 }
  0x38   : > { %p931_p4 = scmp.ne.s32.totalorder %s924_s20, %s930_s29  ;;  %p936_p12 = scmp.lt.s32.totalorder %s934_s2, %s930_s29 }
  0x3a   : > { %p932_p8 = pnand %p931_p4, %p741_p7 }
  0x3c   : > { %p933_p9 = pneg %p932_p8 }
  0x3e   : > { %p938_p11 = pnand %p936_p12, %p933_p9 }
  0x40   : > { %941 = shalt.err (!%p938_p11)
}
  0x41   : > { %s1370_s6 = sshll.u32 %s1381_s10, 4 }
  0x42   : > { %173 = dma.hbm_to_vmem [thread:$0]  (%p741_p7), %s1186_s4, %s1370_s6, %s171_s5, %s1178_s19  }
  0x43 PF: > { %176 = sbr.rel (!%p1136_p5) target bundleno = 101 (0x65), region = 28  ;;  %s177_s7 = sand.u32 (%p1136_p5), 1, %s1067_s15  }
  0x44   : > { %s179_s9 = sand.u32 (%p1136_p5), 1, %s1063_s14   ;;  %s743_s2 = sshll.u32 (%p1136_p5), %s1067_s15, 1 }
  0x45   : > { %s742_s30 = sshll.u32 (%p1136_p5), %s179_s9, 1  ;;  %s183_s11 = ssub.s32 (%p1136_p5), 3, %s743_s2 }
  0x46   : > { %p184_p4 = scmp.lt.s32.totalorder (%p1136_p5), %s183_s11, 2  ;;  %s1218_s17 = scalar_lea.sflag (%p1136_p5), [#allocation6], %s177_s7 }
  0x47   : > { %s181_s19 = scalar_lea.vmem (%p1136_p5), [#allocation5], %s742_s30 }
  0x48   : > { %s1383_s11 = smov (!%p184_p4, %s183_s11), 2 }
  0x49   : > { %s186_s8 = ssub.s32 2, %s1383_s11 }
  0x4a   : > { %s187_s10 = sshll.u32 %s186_s8, 4 }
  0x4b   : > { %188 = vsyncadd %s1218_s17, %s187_s10  ;;  %p744_p5 = scmp.ne.s32.totalorder %s1383_s11, 0  ;;  %s190_s5 = scalar_lea.hbm %s1357_s1, %s743_s2 }
  0x4c   : > { %s191_s27 = sshll.u32 %s1383_s11, 4  ;;  %s192_s28 = sshll.u32 %s190_s5, 4  ;;  %s1226_s28 = int_to_ptr.hbm [resolvable:$true] %s192_s28 }
  0x4d   : > { %s1228_s20 = sshll.u32 %s181_s19, 4  ;;  %s943_s29 = sshra.s32 %s1226_s28, 4  ;;  %s195_s20 = int_to_ptr.vmem [resolvable:$true] %s1228_s20  ;;  %s944_s29 = int_to_ptr.hbm [resolvable:$true] %s943_s29 }
  0x4e   : > { %s945_s6 = sshrl.u32 %s191_s27, 4  ;;  %s954_s2 = scalar_lea.hbm %s1357_s1, 3 }
  0x4f   : > { %s950_s7 = scalar_lea.hbm %s944_s29, %s945_s6  ;;  %p955_p7 = scmp.lt.s32.totalorder %s944_s29, %s1357_s1 }
  0x50   : > { %p951_p11 = scmp.ne.s32.totalorder %s944_s29, %s950_s7  ;;  %p956_p10 = scmp.lt.s32.totalorder %s954_s2, %s950_s7 }
  0x52   : > { %p952_p12 = pnand %p951_p11, %p744_p5  ;;  %p957_p1 = por %p956_p10, %p955_p7 }
  0x54   : > { %p953_p2 = pneg %p952_p12 }
  0x56   : > { %p958_p0 = pnand %p957_p1, %p953_p2 }
  0x58   : > { %961 = shalt.err (!%p958_p0)
}
  0x59   : > { %s962_s19 = sshra.s32 %s195_s20, 4  ;;  %s1073_s4 = smov [#allocation5]   ;;  %s963_s19 = int_to_ptr.vmem [resolvable:$true] %s962_s19 }
  0x5a   : > { %s969_s22 = scalar_lea.vmem %s963_s19, %s945_s6  ;;  %s973_s5 = scalar_lea.vmem %s1073_s4, 4 }
  0x5b   : > { %p970_p3 = scmp.ne.s32.totalorder %s963_s19, %s969_s22  ;;  %p975_p4 = scmp.lt.s32.totalorder %s973_s5, %s969_s22 }
  0x5d   : > { %p971_p8 = pnand %p970_p3, %p744_p5 }
  0x5f   : > { %p972_p9 = pneg %p971_p8 }
  0x61   : > { %p977_p11 = pnand %p975_p4, %p972_p9 }
  0x63   : > { %980 = shalt.err (!%p977_p11)
}
  0x64   : > { %197 = dma.hbm_to_vmem [thread:$0]  (%p744_p5), %s1226_s28, %s191_s27, %s195_s20, %s1218_s17  }
  0x65 PF: > { %203 = sbr.rel (%p1157_p13) target bundleno = 743 (0x2e7), region = 32  ;;  %s1253_s29 = sand.u32 (!%p1157_p13), 1, %s1059_s13  }
  0x66   : > { %s1256_s6 = sshll.u32 (!%p1157_p13), %s1253_s29, 1  ;;  %s206_s7 = scalar_lea.sflag (!%p1157_p13), [#allocation3], %s1253_s29 }
  0x67   : > { %s209_s9 = scalar_lea.vmem (!%p1157_p13), [#allocation2], %s1256_s6 }
  0x6a   : > { %1038 = dma.done.wait (%p1142_p6), %s206_s7, 32  }
  0x6b   : > { %1040 = vsyncadd (%p1142_p6), %s206_s7, 4294967264  ;;  %s215_s26 = sand.u32 1, %s1118_s16   ;;  %s219_s17 = scalar_lea.vmem [#allocation5], %s1256_s6 }
  0x6c   : > { %s216_s11 = scalar_lea.sflag [#allocation6], %s215_s26 }
  0x6d   : > { %1042 = dma.done.wait (%p1142_p6), %s216_s11, 32  }
  0x6e   : > { %1044 = vsyncadd (%p1142_p6), %s216_s11, 4294967264  ;;  %p1371_p13 = scmp.eq.s32.totalorder %s1118_s16, 0 }
  0x70   : > { %1046 = dma.done.wait (%p1371_p13), [#allocation6], 3072   ;;  %p1372_p5 = pmov %p1371_p13 }
  0x71   : > { %v1074_v0 = vmov 1   ;;  %v1075_v1 = vmov 0   ;;  %v269_v2 = vld [vmem:[#allocation7 + $0x10] sm:$0xf]  ;;  %v268_v3 = vld [vmem:[#allocation7 + $0x8] sm:$0xff]  ;;  %v267_v4 = vld [vmem:[#allocation7] sm:$0xff] }
  0x72   : > { %1048 = vsyncadd (%p1372_p5), [#allocation6], 4294964224  ;;  %830 = vset.pattern.permute.xlu0 %v1074_v0  ;;  %832 = vset.pattern.permute.xlu1 %v1075_v1  ;;  %v270_v5 = vld [vmem:[#allocation7 + $0x60] sm:$0xff]  ;;  %v272_v6 = vld [vmem:[#allocation7 + $0x70] sm:$0xf]  ;;  %vm386_vm0 = vcmask 1043456  }
  0x73   : > { %834 = vset.pattern.permute.xlu2 %v1075_v1  ;;  %308 = vperm.xlu0 %830, %v269_v2   ;;  %v271_v7 = vld [vmem:[#allocation7 + $0x68] sm:$0xff]  ;;  %v455_v8 = vld [vmem:[#allocation7 + $0x98] sm:$0xff]  ;;  %v359_v10 = vld [vmem:[#allocation7 + $0x80] sm:$0xff]  ;;  %vm376_vm1 = vcmask 162816   ;;  %vm604_vm2 = vcmask 1040384   ;;  %s252_s23 = scalar_lea.vmem [#allocation8], %s1256_s6 }
  0x74   : > { %280 = vperm.xlu1 %832, %v268_v3   ;;  %275 = vperm.xlu2 %834, %v267_v4   ;;  %v360_v9 = vld [vmem:[#allocation7 + $0x88] sm:$0xf]  ;;  %v358_v11 = vld [vmem:[#allocation7 + $0x78] sm:$0xff]  ;;  %v456_v12 = vld [vmem:[#allocation7 + $0xa0] sm:$0xf]  ;;  %s613_s27 = scalar_lea.sflag [#allocation4], %s1253_s29 }
  0x75   : > { %v454_v13 = vld [vmem:[#allocation7 + $0x90] sm:$0xff]  ;;  %v546_v14 = vld [vmem:[#allocation7 + $0xa8] sm:$0x1]  ;;  %v265_v18 = vld [vmem:[%s209_s9] sm:$0x3]  ;;  %p1373_p6 = scmp.ne.s32.totalorder %s1366_s24, 0 }
  0x76   : > { %v266_v19 = vld [vmem:[%s219_s17] sm:$0x3]  ;;  %v289_v23 = vperm.slane %v265_v18, 0  ;;  %v290_v25 = vperm.slane %v265_v18, 1  ;;  %v356_v61 = vld [vmem:[#allocation7 + $0x20] sm:$0xff]  ;;  %v451_v18 = vld [vmem:[#allocation7 + $0x30] sm:$0xff] }
  0x77   : > { %v312_v24 = vperm.slane %v266_v19, 0  ;;  %v313_v26 = vperm.slane %v266_v19, 1  ;;  %v355_v58 = vld [vmem:[#allocation7 + $0x18] sm:$0xff]  ;;  %v357_v62 = vld [vmem:[#allocation7 + $0x28] sm:$0xf]  ;;  %s771_s28 = sshll.u32 (%p1373_p6), %s1118_s16, 1 }
  0x78   : > { %s621_s20 = ssub.s32 (%p1373_p6), 3, %s771_s28 }
  0x79   : > { %p622_p12 = scmp.lt.s32.totalorder (%p1373_p6), %s621_s20, 2 }
  0x7b   : > { %831 = vset.pattern.permute.xlu0 %v1075_v1 }
  0x7c   : > { %833 = vset.pattern.permute.xlu1 %v1074_v0  ;;  %285 = vperm.xlu0 %831, %v269_v2  }
  0x7d   : > { %304 = vperm.xlu1 %833, %v268_v3   ;;  %835 = vset.pattern.permute.xlu2 %v1074_v0 }
  0x7e   : > { %300 = vperm.xlu2 %835, %v267_v4  }
  0x84   : > { %330 = vperm.xlu0 %831, %v270_v5  }
  0x85   : > { %836 = vset.pattern.permute.xlu1 %v1075_v1 }
  0x86   : > { %340 = vperm.xlu1 %836, %v272_v6   ;;  %837 = vset.pattern.permute.xlu2 %v1075_v1 }
  0x87   : > { %335 = vperm.xlu2 %837, %v271_v7  }
  0x8c   : > { %464 = vperm.xlu0 %831, %v455_v8  }
  0x8e   : > { %373 = vperm.xlu1 %836, %v360_v9  }
  0x8f   : > { %368 = vperm.xlu2 %837, %v359_v10  }
  0x96   : > { %363 = vperm.xlu1 %836, %v358_v11  }
  0x97   : > { %469 = vperm.xlu2 %837, %v456_v12  }
  0x9e   : > { %459 = vperm.xlu1 %836, %v454_v13  }
  0x9f   : > { %549 = vperm.xlu2 %837, %v546_v14  }
  0xce   : > { %v276_v15 = vpop.permute.xlu2 %275 }
  0xcf   : > { %v293_v35 = vmul.f32 %v289_v23, %v276_v15  ;;  %v294_v36 = vmul.f32 %v290_v25, %v276_v15 }
  0xd8   : > { %v301_v20 = vpop.permute.xlu2 %300 }
  0xd9   : > { %v316_v37 = vmul.f32 %v312_v24, %v301_v20  ;;  %v317_v39 = vmul.f32 %v313_v26, %v301_v20 }
  0xdb   : > { %v322_v49 = vadd.f32 %v316_v37, %v293_v35  ;;  %v323_v51 = vadd.f32 %v317_v39, %v294_v36 }
  0xe1   : > { %v336_v44 = vpop.permute.xlu2 %335 }
  0xe5   : > { %v309_v17 = vpop.permute.xlu0 %308 }
  0xe6   : > { %v281_v16 = vpop.permute.xlu1 %280  ;;  %v320_v33 = vmul.f32 %v312_v24, %v309_v17  ;;  %v321_v34 = vmul.f32 %v313_v26, %v309_v17 }
  0xe7   : > { %v295_v31 = vmul.f32 %v289_v23, %v281_v16  ;;  %v296_v32 = vmul.f32 %v290_v25, %v281_v16 }
  0xe9   : > { %v369_v4 = vpop.permute.xlu2 %368 }
  0xee   : > { %v286_v21 = vpop.permute.xlu0 %285 }
  0xef   : > { %v305_v22 = vpop.permute.xlu1 %304  ;;  %v297_v28 = vmul.f32 %v289_v23, %v286_v21  ;;  %v298_v29 = vmul.f32 %v290_v25, %v286_v21  ;;  %v452_v21 = vld [vmem:[#allocation7 + $0x38] sm:$0xff] }
  0xf0   : > { %v318_v27 = vmul.f32 %v312_v24, %v305_v22  ;;  %v319_v30 = vmul.f32 %v313_v26, %v305_v22  ;;  %v453_v22 = vld [vmem:[#allocation7 + $0x40] sm:$0xf] }
  0xf1   : > { %v326_v41 = vadd.f32 %v320_v33, %v297_v28  ;;  %v327_v42 = vadd.f32 %v321_v34, %v298_v29 }
  0xf2   : > { %v324_v38 = vadd.f32 %v318_v27, %v295_v31  ;;  %v325_v40 = vadd.f32 %v319_v30, %v296_v32  ;;  %v470_v27 = vpop.permute.xlu2 %469 }
  0xf4   : > { %v345_v48 = vadd.f32 %v336_v44, %v324_v38  ;;  %v346_v50 = vadd.f32 %v336_v44, %v325_v40 }
  0xf6   : > { %v331_v45 = vpop.permute.xlu0 %330 }
  0xf7   : > { %v343_v52 = vadd.f32 %v331_v45, %v322_v49  ;;  %v344_v53 = vadd.f32 %v331_v45, %v323_v51 }
  0xf8   : > { %v341_v43 = vpop.permute.xlu1 %340 }
  0xf9   : > { %v347_v46 = vadd.f32 %v341_v43, %v326_v41  ;;  %v348_v47 = vadd.f32 %v341_v43, %v327_v42  ;;  %v545_v42 = vld [vmem:[#allocation7 + $0x48] sm:$0x1] }
  0xfa   : > { %v550_v45 = vpop.permute.xlu2 %549 }
  0xfb   : > { %838 = vtanh.f32 %v347_v46  ;;  %v607_v46 = vlaneseq }
  0xfc   : > { %840 = vtanh.f32 %v348_v47 }
  0xfd   : > { %842 = vtanh.f32 %v345_v48  ;;  %vm609_vm3 = vcmp.lt.s32.totalorder %v607_v46, 256 }
  0xfe   : > { %844 = vtanh.f32 %v346_v50  ;;  %v465_v28 = vpop.permute.xlu0 %464 }
  0xff   : > { %846 = vtanh.f32 %v343_v52 }
 0x100   : > { %848 = vtanh.f32 %v344_v53  ;;  %v374_v1 = vpop.permute.xlu1 %373 }
 0x101   : > { %v839_v54 = vpop.eup %838 }
 0x102   : > { %v841_v55 = vpop.eup %840  ;;  %750 = vmatpush.msk.msra.mxu0 %vm386_vm0, %v839_v54 }
 0x103   : > { %v843_v56 = vpop.eup %842  ;;  %754 = vmatpush.msk.msra.mxu1 %vm386_vm0, %v841_v55 }
 0x104   : > { %v845_v57 = vpop.eup %844  ;;  %407 = vmatpush.msra.mxu0 %v843_v56 }
 0x105   : > { %v847_v59 = vpop.eup %846  ;;  %433 = vmatpush.msra.mxu1 %v845_v57 }
 0x106   : > { %v849_v60 = vpop.eup %848  ;;  %408 = vmatpush.msra.mxu0 %v847_v59 }
 0x107   : > { %434 = vmatpush.msra.mxu1 %v849_v60  ;;  %751 = vmatmul.msk.f32.vlgmr.msra.gmra.mxu0 %vm376_vm1, %v355_v58 }
 0x108   : > { %755 = vmatmul.msk.f32.vlgmr.msra.gmra.mxu1 %vm376_vm1, %v355_v58  ;;  %v364_v9 = vpop.permute.xlu1 %363 }
 0x10f   : > { %752 = vmatmul.msk.f32.gmra.mxu0 %vm376_vm1, %v356_v61 }
 0x110   : > { %756 = vmatmul.msk.f32.gmra.mxu1 %vm376_vm1, %v356_v61  ;;  %v460_v33 = vpop.permute.xlu1 %459 }
 0x117   : > { %753 = vmatmul.msk.f32.gmra.mxu0 %vm376_vm1, %v357_v62 }
 0x118   : > { %757 = vmatmul.msk.f32.gmra.mxu1 %vm376_vm1, %v357_v62 }
 0x184   : > { %v410_v63 = vpop.f32.mrf.mxu0 }
 0x185   : > { %v436_v0 = vpop.f32.mrf.mxu1  ;;  %v411_v12 = vadd.f32 %v410_v63, %v364_v9 }
 0x186   : > { %v437_v13 = vadd.f32 %v436_v0, %v364_v9 }
 0x18c   : > { %v413_v2 = vpop.f32.mrf.mxu0 }
 0x18d   : > { %v439_v3 = vpop.f32.mrf.mxu1  ;;  %v414_v6 = vadd.f32 %v413_v2, %v369_v4 }
 0x18e   : > { %v440_v10 = vadd.f32 %v439_v3, %v369_v4 }
 0x194   : > { %v416_v5 = vpop.f32.mrf.mxu0 }
 0x195   : > { %v417_v7 = vadd.f32 %v416_v5, %v374_v1  ;;  %v442_v8 = vpop.f32.mrf.mxu1 }
 0x196   : > { %v443_v11 = vadd.f32 %v442_v8, %v374_v1 }
 0x197   : > { %850 = vtanh.f32 %v417_v7 }
 0x198   : > { %852 = vtanh.f32 %v443_v11 }
 0x199   : > { %854 = vtanh.f32 %v414_v6 }
 0x19a   : > { %856 = vtanh.f32 %v440_v10 }
 0x19b   : > { %858 = vtanh.f32 %v411_v12 }
 0x19c   : > { %860 = vtanh.f32 %v437_v13 }
 0x19d   : > { %v851_v14 = vpop.eup %850 }
 0x19e   : > { %v853_v15 = vpop.eup %852  ;;  %758 = vmatpush.msk.msra.mxu2 %vm386_vm0, %v851_v14 }
 0x19f   : > { %v855_v16 = vpop.eup %854  ;;  %762 = vmatpush.msk.msra.mxu3 %vm386_vm0, %v853_v15 }
 0x1a0   : > { %v857_v17 = vpop.eup %856  ;;  %501 = vmatpush.msra.mxu2 %v855_v16 }
 0x1a1   : > { %v859_v19 = vpop.eup %858  ;;  %527 = vmatpush.msra.mxu3 %v857_v17 }
 0x1a2   : > { %v861_v20 = vpop.eup %860  ;;  %502 = vmatpush.msra.mxu2 %v859_v19 }
 0x1a3   : > { %528 = vmatpush.msra.mxu3 %v861_v20  ;;  %759 = vmatmul.msk.f32.vlgmr.msra.gmra.mxu2 %vm376_vm1, %v451_v18 }
 0x1a4   : > { %763 = vmatmul.msk.f32.vlgmr.msra.gmra.mxu3 %vm376_vm1, %v451_v18 }
 0x1ab   : > { %760 = vmatmul.msk.f32.gmra.mxu2 %vm376_vm1, %v452_v21 }
 0x1ac   : > { %764 = vmatmul.msk.f32.gmra.mxu3 %vm376_vm1, %v452_v21 }
 0x1b3   : > { %761 = vmatmul.msk.f32.gmra.mxu2 %vm376_vm1, %v453_v22 }
 0x1b4   : > { %765 = vmatmul.msk.f32.gmra.mxu3 %vm376_vm1, %v453_v22 }
 0x226   : > { %v504_v23 = vpop.f32.mrf.mxu2 }
 0x227   : > { %v530_v24 = vpop.f32.mrf.mxu3  ;;  %v505_v36 = vadd.f32 %v504_v23, %v460_v33 }
 0x228   : > { %v531_v37 = vadd.f32 %v530_v24, %v460_v33 }
 0x22e   : > { %v507_v25 = vpop.f32.mrf.mxu2 }
 0x22f   : > { %v533_v26 = vpop.f32.mrf.mxu3  ;;  %v508_v30 = vadd.f32 %v507_v25, %v465_v28 }
 0x230   : > { %v534_v34 = vadd.f32 %v533_v26, %v465_v28 }
 0x236   : > { %v510_v29 = vpop.f32.mrf.mxu2 }
 0x237   : > { %v511_v31 = vadd.f32 %v510_v29, %v470_v27  ;;  %v536_v32 = vpop.f32.mrf.mxu3 }
 0x238   : > { %v537_v35 = vadd.f32 %v536_v32, %v470_v27 }
 0x239   : > { %862 = vtanh.f32 %v511_v31 }
 0x23a   : > { %864 = vtanh.f32 %v537_v35 }
 0x23b   : > { %866 = vtanh.f32 %v508_v30 }
 0x23c   : > { %868 = vtanh.f32 %v534_v34 }
 0x23d   : > { %870 = vtanh.f32 %v505_v36 }
 0x23e   : > { %872 = vtanh.f32 %v531_v37 }
 0x23f   : > { %v863_v38 = vpop.eup %862 }
 0x240   : > { %v865_v39 = vpop.eup %864  ;;  %766 = vmatpush.msk.msrb.mxu0 %vm386_vm0, %v863_v38 }
 0x241   : > { %v867_v40 = vpop.eup %866  ;;  %768 = vmatpush.msk.msrb.mxu1 %vm386_vm0, %v865_v39 }
 0x242   : > { %v869_v41 = vpop.eup %868  ;;  %575 = vmatpush.msrb.mxu0 %v867_v40 }
 0x243   : > { %v871_v43 = vpop.eup %870  ;;  %595 = vmatpush.msrb.mxu1 %v869_v41 }
 0x244   : > { %v873_v44 = vpop.eup %872  ;;  %576 = vmatpush.msrb.mxu0 %v871_v43 }
 0x245   : > { %596 = vmatpush.msrb.mxu1 %v873_v44  ;;  %767 = vmatmul.msk.f32.vlgmr.msrb.gmra.mxu0 %vm376_vm1, %v545_v42 }
 0x246   : > { %769 = vmatmul.msk.f32.vlgmr.msrb.gmra.mxu1 %vm376_vm1, %v545_v42 }
 0x2c2   : > { %v578_v47 = vpop.f32.mrf.mxu0 }
 0x2c3   : > { %v598_v48 = vpop.f32.mrf.mxu1  ;;  %v579_v50 = vadd.f32 %v578_v47, %v550_v45 }
 0x2c4   : > { %v599_v49 = vadd.f32 %v598_v48, %v550_v45 }
 0x2c5   : > { %619 = sbr.rel (!%p1373_p6) target bundleno = 743 (0x2e7), region = 48 }
 0x2c6   : > { %v603_v51 = vrot.slane %v599_v49, 7 }
 0x2c8   : > { %v605_v52 = vsel %vm604_vm2, %v579_v50, %v603_v51 }
 0x2c9   : > { %611 = vst.msk [vmem:[%s252_s23] sm:$0x3] %vm609_vm3, %v605_v52 }
 0x2ca   : > { %s1385_s20 = smov (!%p622_p12, %s621_s20), 2 }
 0x2cb   : > { %s624_s30 = ssub.s32 2, %s1385_s20 }
 0x2cc   : > { %s625_s2 = sshll.u32 %s624_s30, 4 }
 0x2cd   : > { %626 = vsyncadd %s613_s27, %s625_s2  ;;  %p772_p2 = scmp.ne.s32.totalorder %s1385_s20, 0  ;;  %s628_s10 = scalar_lea.hbm %s1359_s3, %s771_s28 }
 0x2ce   : > { %s629_s19 = sshll.u32 %s1385_s20, 4  ;;  %s1313_s16 = sshll.u32 %s252_s23, 4  ;;  %s631_s16 = int_to_ptr.vmem [resolvable:$true] %s1313_s16 }
 0x2cf   : > { %s632_s22 = sshll.u32 %s628_s10, 4  ;;  %s982_s4 = sshra.s32 %s631_s16, 4  ;;  %s633_s22 = int_to_ptr.hbm [resolvable:$true] %s632_s22  ;;  %s983_s4 = int_to_ptr.vmem [resolvable:$true] %s982_s4 }
 0x2d0   : > { %s984_s5 = sshrl.u32 %s629_s19, 4  ;;  %s1076_s7 = smov [#allocation8]  }
 0x2d1   : > { %s989_s6 = scalar_lea.vmem %s983_s4, %s984_s5  ;;  %s993_s9 = scalar_lea.vmem %s1076_s7, 4 }
 0x2d2   : > { %p990_p7 = scmp.ne.s32.totalorder %s983_s4, %s989_s6  ;;  %p995_p0 = scmp.lt.s32.totalorder %s993_s9, %s989_s6 }
 0x2d4   : > { %p991_p10 = pnand %p990_p7, %p772_p2 }
 0x2d6   : > { %p992_p1 = pneg %p991_p10 }
 0x2d8   : > { %p997_p3 = pnand %p995_p0, %p992_p1 }
 0x2da   : > { %1000 = shalt.err (!%p997_p3)
}
 0x2db   : > { %s1001_s26 = sshra.s32 %s633_s22, 4  ;;  %s1012_s28 = scalar_lea.hbm %s1359_s3, 3  ;;  %s1002_s26 = int_to_ptr.hbm [resolvable:$true] %s1001_s26 }
 0x2dc   : > { %s1008_s11 = scalar_lea.hbm %s1002_s26, %s984_s5  ;;  %p1013_p11 = scmp.lt.s32.totalorder %s1002_s26, %s1359_s3 }
 0x2dd   : > { %p1009_p8 = scmp.ne.s32.totalorder %s1002_s26, %s1008_s11  ;;  %p1014_p13 = scmp.lt.s32.totalorder %s1012_s28, %s1008_s11 }
 0x2df   : > { %p1010_p9 = pnand %p1009_p8, %p772_p2  ;;  %p1015_p5 = por %p1014_p13, %p1013_p11 }
 0x2e1   : > { %p1011_p4 = pneg %p1010_p9 }
 0x2e3   : > { %p1016_p6 = pnand %p1015_p5, %p1011_p4 }
 0x2e5   : > { %1019 = shalt.err (!%p1016_p6)
}
 0x2e6   : > { %635 = dma.vmem_to_hbm [thread:$0]  (%p772_p2), %s631_s16, %s629_s19, %s633_s22, %s613_s27  }
 0x2e7 PF: > { %s644_s8 = sand.u32 1, %s1055_s12   ;;  %p1374_p12 = scmp.ne.s32.totalorder %s1367_s25, 0 }
 0x2e8   : > { %p1375_p7 = scmp.ge.s32.totalorder %s1067_s15, 2  ;;  %s645_s24 = scalar_lea.sflag [#allocation4], %s644_s8 }
 0x2ea   : > { %p787_p10 = pnand %p1375_p7, %p1374_p12 }
 0x2ec   : > { %p788_p1 = pneg %p787_p10 }
 0x2ee   : > { %1050 = dma.done.wait (%p788_p1), %s645_s24, 32  }
 0x2ef   : > { %1052 = vsyncadd (%p788_p1), %s645_s24, 4294967264  ;;  %p19_p0 = scmp.ge.s32.totalorder %s1122_s18, 4   ;;  %s1376_s12 = smov %s1059_s13 }
 0x2f0   : > { %s1377_s13 = smov %s1063_s14  ;;  %s1378_s14 = smov %s1134_s21 }
 0x2f1   : > { %s1379_s15 = smov %s1122_s18  ;;  %21 = sbr.rel (!%p19_p0) target bundleno = 9 (0x9), region = 94 }
 0x2f6   :  { %651 = vsyncpa [#allocation3], 1 }
 0x2f7   :  { %653 = vsyncpa [#allocation3 + $0x1], 1 }
 0x2f8   :  { %654 = vsyncpa [#allocation6], 1 }
 0x2f9   :  { %656 = vsyncpa [#allocation6 + $0x1], 1 }
 0x2fa   :  { %657 = vsyncpa [#allocation4], 1 }
 0x2fb   :  { %659 = vsyncpa [#allocation4 + $0x1], 1 }

</bundles_post_ra>
